<compile_context>
chip_gen: v7x
topology: tpu7x:2x2x1
jax: 0.10.0
libtpu: 0.0.40
codegen_flags: <defaults>
</compile_context>

<pallas_src>
from functools import partial

import jax
import jax.numpy as jnp
from jax.experimental import pallas as pl
from jax.experimental.pallas import tpu as pltpu


def _pick_k_tile(d_in, c_out, in_bytes, weight_budget=4 * 1024 * 1024):
    """Keep the weight resident unless it exceeds ~4 MB; then split K."""
    if d_in * c_out * in_bytes <= weight_budget or d_in <= 256:
        return d_in
    for tk in (2048, 1024, 512, 256, 128):
        if tk < d_in and d_in % tk == 0:  # only clean splits (no garbage K tail)
            return tk
    return d_in


def _pick_row_tile(m, tk, c_out, in_bytes, out_bytes, budget=14 * 1024 * 1024):
    """Largest row tile whose double-buffered working set fits the budget."""
    def fits(tm):
        need = (2 * tm * tk * in_bytes        # x block, double-buffered
                + 2 * tk * c_out * in_bytes   # weight block, double-buffered
                + 2 * tm * c_out * out_bytes  # out block, double-buffered
                + tm * c_out * 4)             # f32 accumulator scratch
        return need <= budget

    if m <= 2048 and fits(m):
        return m                              # single full-M block (also m < 8)
    for tm in (2048, 1024, 512, 256, 128, 64, 32, 16, 8):
        if tm <= m and fits(tm):
            return tm
    return 8


def _patch_emb_kernel(x_ref, w_ref, b_ref, o_ref, acc_ref):
    # x_ref: (TM, TK)   rows of patch-flattened pixels
    # w_ref: (TK, C_out) transposed Linear weight slab
    # b_ref: (1, C_out)  bias (f32)
    # o_ref: (TM, C_out) output rows
    # acc_ref: (TM, C_out) f32 accumulator scratch (for the K-split case)
    k = pl.program_id(1)

    @pl.when(k == 0)
    def _():
        acc_ref[...] = jnp.zeros_like(acc_ref)

    # Single MXU contraction over the full K tile (f32 accumulation).
    acc_ref[...] += jnp.dot(x_ref[...], w_ref[...],
                            preferred_element_type=jnp.float32)

    @pl.when(k == pl.num_programs(1) - 1)
    def _():
        o_ref[...] = (acc_ref[...] + b_ref[...].astype(jnp.float32)
                      ).astype(o_ref.dtype)


def prepare_patch_emb_params(weight, bias, *, compute_dtype=None):
    """One-time re-layout of the nn.Linear params (hoisted off the hot path).

    weight: (C_out, D_in) torch-style.  Returns w_t (D_in, C_out) in
    `compute_dtype` (or original dtype) and bias as (1, C_out) f32 so the
    epilogue add stays f32 (v5e has no bf16 VALU).
    """
    w_t = jnp.asarray(weight).T                       # (D_in, C_out), lane-dense
    if compute_dtype is not None:
        w_t = w_t.astype(compute_dtype)
    b = jnp.asarray(bias).reshape(1, -1).astype(jnp.float32)
    return w_t, b


@partial(jax.jit, static_argnames=("patch",))
def patch_embedding_forward(img, w_t, b, *, patch):
    """img: (N, C, H, W); w_t: (D_in, C_out) pre-transposed; b: (1, C_out)."""
    N, C, H, W = img.shape
    P = patch * patch
    img_size = H * W
    assert img_size % P == 0, "img is not divisible with patch"
    S = img_size // P
    D_in, C_out = w_t.shape
    assert D_in == P * C
    assert b.shape == (1, C_out)

    compute_dtype = w_t.dtype          # bf16 in production, f32 here for checks
    out_dtype = img.dtype

    # Patch gather as one XLA transpose pass: (N,C,S,P) -> (N,S,C,P) -> rows.
    # Cheaper than feeding the MXU a K=P (=16) contraction when P < 128.
    x = img.astype(compute_dtype).reshape(N, C, S, P)
    x = jnp.transpose(x, (0, 2, 1, 3)).reshape(N * S, D_in)

    M = N * S
    in_bytes = jnp.dtype(compute_dtype).itemsize
    out_bytes = jnp.dtype(out_dtype).itemsize
    TK = _pick_k_tile(D_in, C_out, in_bytes)
    TM = _pick_row_tile(M, TK, C_out, in_bytes, out_bytes)
    grid = (pl.cdiv(M, TM), pl.cdiv(D_in, TK))

    cost = pl.CostEstimate(
        flops=2 * M * D_in * C_out,
        transcendentals=0,
        bytes_accessed=(M * D_in * in_bytes + D_in * C_out * in_bytes
                        + C_out * 4 + M * C_out * out_bytes),
    )

    out = pl.pallas_call(
        _patch_emb_kernel,
        out_shape=jax.ShapeDtypeStruct((M, C_out), out_dtype),
        grid_spec=pltpu.PrefetchScalarGridSpec(
            num_scalar_prefetch=0,
            grid=grid,
            in_specs=[
                pl.BlockSpec((TM, TK), lambda i, k: (i, k)),
                pl.BlockSpec((TK, C_out), lambda i, k: (k, 0)),
                pl.BlockSpec((1, C_out), lambda i, k: (0, 0)),
            ],
            out_specs=pl.BlockSpec((TM, C_out), lambda i, k: (i, 0)),
            scratch_shapes=[pltpu.VMEM((TM, C_out), jnp.float32)],
        ),
        compiler_params=pltpu.CompilerParams(
            dimension_semantics=("parallel", "arbitrary")),
        cost_estimate=cost,
    )(x, w_t, b)

    return out.reshape(N, S, C_out)


if __name__ == "__main__":
    # Small shapes consistent with the module.
    height, width, channel, patch, C_hidden = 16, 16, 4, 4, 32
    N = 2
    patch_size = patch * patch                     # 16
    seq_length = (height * width) // patch_size    # 16
    input_dim = patch_size * channel               # 64

    key = jax.random.PRNGKey(0)
    k_img, k_w, k_b = jax.random.split(key, 3)

    img = jax.random.normal(k_img, (N, channel, height, width),
                            dtype=jnp.float32)

    # Deterministic Linear params (PyTorch-default-style uniform bounds).
    bound = 1.0 / (input_dim ** 0.5)
    weight = jax.random.uniform(k_w, (C_hidden, input_dim), jnp.float32,
                                -bound, bound)
    bias = jax.random.uniform(k_b, (C_hidden,), jnp.float32, -bound, bound)

    # Pure-JAX reference (same math as the torch forward).
    x_r = img.reshape(N, channel, seq_length, patch_size)
    x_r = jnp.transpose(x_r, (0, 2, 1, 3)).reshape(N, seq_length, input_dim)
    ref = x_r @ weight.T + bias

    # f32 path (tight tolerance).
    w_t, b_k = prepare_patch_emb_params(weight, bias)
    out = jax.block_until_ready(
        patch_embedding_forward(img, w_t, b_k, patch=patch))
    assert out.shape == (N, seq_length, C_hidden)
    assert jnp.allclose(out, ref, atol=2e-5, rtol=2e-5)

    # bf16-input path (production setting on v5e/v6e/v7x: kernel is HBM-bound
    # after the K-occupancy fix, so halving activation bytes is the big lever).
    w_bf, b_bf = prepare_patch_emb_params(weight, bias,
                                          compute_dtype=jnp.bfloat16)
    out_bf = jax.block_until_ready(
        patch_embedding_forward(img, w_bf, b_bf, patch=patch))
    assert jnp.allclose(out_bf, ref, atol=3e-2, rtol=3e-2)

    print("KERNEL_OK")
</pallas_src>

<mosaic_0001>
module attributes {stable_mosaic.version = 11 : i64} {
  func.func @_patch_emb_kernel(%arg0: i32, %arg1: i32, %arg2: memref<32x64xf32, #tpu.memory_space<vmem>>, %arg3: memref<64x32xf32, #tpu.memory_space<vmem>>, %arg4: memref<1x32xf32, #tpu.memory_space<vmem>>, %arg5: memref<32x32xf32, #tpu.memory_space<vmem>>, %arg6: memref<32x32xf32, #tpu.memory_space<vmem>>) attributes {dimension_semantics = [#tpu.dimension_semantics<parallel>, #tpu.dimension_semantics<arbitrary>], iteration_bounds = array<i64: 1, 1>, scalar_prefetch = 0 : i64, scratch_operands = 1 : i64, tpu.core_type = #tpu.core_type<tc>, window_params = [{transform_indices = @transform_0, window_bounds = array<i64: 32, 64>}, {transform_indices = @transform_1, window_bounds = array<i64: 64, 32>}, {pipeline_mode = #tpu.pipeline_mode<synchronous>, transform_indices = @transform_2, window_bounds = array<i64: 1, 32>}, {transform_indices = @transform_3, window_bounds = array<i64: 32, 32>}]} {
    %c0_i32 = arith.constant 0 : i32
    %0 = arith.cmpi eq, %arg1, %c0_i32 : i32
    %1 = arith.extui %0 : i1 to i32
    %c0_i32_0 = arith.constant 0 : i32
    %2 = arith.cmpi ne, %1, %c0_i32_0 : i32
    scf.if %2 {
      %cst_10 = arith.constant 0.000000e+00 : f32
      %12 = vector.broadcast %cst_10 : f32 to vector<32x32xf32>
      %c0_11 = arith.constant 0 : index
      %c0_12 = arith.constant 0 : index
      %13 = vector.load %arg6[%c0_11, %c0_12] : memref<32x32xf32, #tpu.memory_space<vmem>>, vector<32x32xf32>
      tpu.vector_store %arg6[%c0_11, %c0_12], %12 {strides = array<i32>} : memref<32x32xf32, #tpu.memory_space<vmem>>, vector<32x32xf32>,
    } else {
    }
    %c0 = arith.constant 0 : index
    %c0_1 = arith.constant 0 : index
    %3 = vector.load %arg6[%c0, %c0_1] : memref<32x32xf32, #tpu.memory_space<vmem>>, vector<32x32xf32>
    %c0_2 = arith.constant 0 : index
    %c0_3 = arith.constant 0 : index
    %4 = vector.load %arg2[%c0_2, %c0_3] : memref<32x64xf32, #tpu.memory_space<vmem>>, vector<32x64xf32>
    %c0_4 = arith.constant 0 : index
    %c0_5 = arith.constant 0 : index
    %5 = vector.load %arg3[%c0_4, %c0_5] : memref<64x32xf32, #tpu.memory_space<vmem>>, vector<64x32xf32>
    %cst = arith.constant dense<0.000000e+00> : vector<32x32xf32>
    %6 = tpu.matmul %4, %5, %cst {dimension_numbers = #tpu.dot_dimension_numbers<[1], [0], [0], [1], [0, 0, 1, 1], [], []>} : vector<32x64xf32>, vector<64x32xf32>, vector<32x32xf32> -> vector<32x32xf32>
    %7 = arith.addf %3, %6 : vector<32x32xf32>
    %c0_6 = arith.constant 0 : index
    %c0_7 = arith.constant 0 : index
    %8 = vector.load %arg6[%c0_6, %c0_7] : memref<32x32xf32, #tpu.memory_space<vmem>>, vector<32x32xf32>
    tpu.vector_store %arg6[%c0_6, %c0_7], %7 {strides = array<i32>} : memref<32x32xf32, #tpu.memory_space<vmem>>, vector<32x32xf32>,
    %c0_i32_8 = arith.constant 0 : i32
    %9 = arith.cmpi eq, %arg1, %c0_i32_8 : i32
    %10 = arith.extui %9 : i1 to i32
    %c0_i32_9 = arith.constant 0 : i32
    %11 = arith.cmpi ne, %10, %c0_i32_9 : i32
    scf.if %11 {
      %c0_10 = arith.constant 0 : index
      %c0_11 = arith.constant 0 : index
      %12 = vector.load %arg6[%c0_10, %c0_11] : memref<32x32xf32, #tpu.memory_space<vmem>>, vector<32x32xf32>
      %c0_12 = arith.constant 0 : index
      %c0_13 = arith.constant 0 : index
      %13 = vector.load %arg4[%c0_12, %c0_13] : memref<1x32xf32, #tpu.memory_space<vmem>>, vector<1x32xf32>
      %14 = vector.broadcast %13 : vector<1x32xf32> to vector<32x32xf32>
      %15 = arith.addf %12, %14 : vector<32x32xf32>
      %c0_14 = arith.constant 0 : index
      %c0_15 = arith.constant 0 : index
      %16 = vector.load %arg5[%c0_14, %c0_15] : memref<32x32xf32, #tpu.memory_space<vmem>>, vector<32x32xf32>
      tpu.vector_store %arg5[%c0_14, %c0_15], %15 {strides = array<i32>} : memref<32x32xf32, #tpu.memory_space<vmem>>, vector<32x32xf32>,
    } else {
    }
    return
  }
  func.func @transform_0(%arg0: i32, %arg1: i32) -> (i32, i32) {
    %c0_i32 = arith.constant 0 : i32
    return %arg0, %arg1 : i32, i32
  }
  func.func @transform_1(%arg0: i32, %arg1: i32) -> (i32, i32) {
    %c0_i32 = arith.constant 0 : i32
    %c0_i32_0 = arith.constant 0 : i32
    return %arg1, %c0_i32 : i32, i32
  }
  func.func @transform_2(%arg0: i32, %arg1: i32) -> (i32, i32) {
    %c0_i32 = arith.constant 0 : i32
    %c0_i32_0 = arith.constant 0 : i32
    %c0_i32_1 = arith.constant 0 : i32
    return %c0_i32, %c0_i32_0 : i32, i32
  }
  func.func @transform_3(%arg0: i32, %arg1: i32) -> (i32, i32) {
    %c0_i32 = arith.constant 0 : i32
    %c0_i32_0 = arith.constant 0 : i32
    return %arg0, %c0_i32 : i32, i32
  }
}

</mosaic_0001>

<bundles_post_ra>
// kernel: patch_embedding_forward.1
= control target key start
LH: loop header
LB: loop body
LE: loop exit
PB: predicated region body
PF: predicated region fallthrough
CT: control target
= control target key end

     0   :  { %vm19_vm0 = vcmask 261120   ;;  %v276_v5 = vmov 0.0   ;;  %vm40_vm1 = vcmask 523264   ;;  %s367_s0 = inlined_call_operand.vmem [shape: f32[32,64], index: 0, kind: input, shape index: {}]   ;;  %s368_s1 = inlined_call_operand.vmem [shape: f32[64,32], index: 1, kind: input, shape index: {}]   ;;  %s369_s2 = inlined_call_operand.vmem [shape: f32[1,32], index: 2, kind: input, shape index: {}]   ;;  %s370_s3 = inlined_call_operand.hbm [shape: f32[32,32], index: 3, kind: output, shape index: {}]  }
   0x1   :  { %v32_v0 = vld [vmem:[%s368_s1] sm:$0xff]  ;;  %v33_v1 = vld [vmem:[%s368_s1 + $0x8] sm:$0xff]  ;;  %v34_v2 = vld [vmem:[%s368_s1 + $0x10] sm:$0xff]  ;;  %21 = vst.msk [vmem:[#allocation2 + $0x8] sm:$0xff] %vm19_vm0, %v276_v5 }
   0x2   :  { %v224_v3 = vpack.c.bf16 %v33_v1, %v32_v0  ;;  %v35_v4 = vld [vmem:[%s368_s1 + $0x18] sm:$0xff]  ;;  %20 = vst.msk [vmem:[#allocation2] sm:$0xff] %vm19_vm0, %v276_v5  ;;  %22 = vst.msk [vmem:[#allocation2 + $0x10] sm:$0xff] %vm19_vm0, %v276_v5  ;;  %v36_v7 = vld [vmem:[%s368_s1 + $0x20] sm:$0xff] }
   0x3   :  { %23 = vst.msk [vmem:[#allocation2 + $0x18] sm:$0xff] %vm19_vm0, %v276_v5  ;;  %v228_v6 = vpack.c.bf16 %v35_v4, %v34_v2  ;;  %v37_v8 = vld [vmem:[%s368_s1 + $0x28] sm:$0xff]  ;;  %v28_v9 = vld [vmem:[%s367_s0] sm:$0xff]  ;;  %v30_v10 = vld [vmem:[%s367_s0 + $0x10] sm:$0xff] }
   0x4   :  { %225 = vmatprep.subr.bf16.mxu0 %v224_v3  ;;  %240 = vmatprep.subr.bf16.mxu1 %v224_v3 }
   0x5   :  { %227 = vmatpush3.bf16.msra.mxu0 %v224_v3  ;;  %244 = vmatpush3.bf16.msra.mxu1 %v224_v3 }
   0x6   :  { %8 = vsyncpa [#allocation4], 0  ;;  %229 = vmatprep.subr.bf16.mxu0 %v228_v6  ;;  %241 = vmatprep.subr.bf16.mxu1 %v228_v6  ;;  %v232_v11 = vpack.c.bf16 %v37_v8, %v36_v7  ;;  %v38_v12 = vld [vmem:[%s368_s1 + $0x30] sm:$0xff]  ;;  %v39_v13 = vld [vmem:[%s368_s1 + $0x38] sm:$0xff]  ;;  %s277_s9 = smov [#allocation3]  }
   0x7   :  { %218 = vmatprep.mubr.msk.f32.mxu0 %vm40_vm1, %v28_v9  ;;  %221 = vmatprep.mubr.msk.f32.mxu1 %vm40_vm1, %v30_v10  ;;  %v236_v14 = vpack.c.bf16 %v39_v13, %v38_v12  ;;  %v29_v15 = vld [vmem:[%s367_s0 + $0x8] sm:$0xff]  ;;  %v31_v16 = vld [vmem:[%s367_s0 + $0x18] sm:$0xff]  ;;  %v189_v29 = vld [vmem:[%s369_s2] ss:$0 sm:$0xff]  ;;  %s174_s10 = sshll.u32 %s277_s9, 4  ;;  %s175_s10 = int_to_ptr.vmem [resolvable:$true] %s174_s10 }
   0x8   :  { %v25_v17 = vld [vmem:[#allocation2 + $0x8] sm:$0xff]  ;;  %s252_s2 = scalar_lea.vmem %s175_s10, 512  ;;  %p257_p1 = scmp.lt.s32.totalorder %s175_s10, %s175_s10 }
   0x9   :  { %231 = vmatpush3.bf16.msra.mxu0 %v228_v6  ;;  %245 = vmatpush3.bf16.msra.mxu1 %v228_v6  ;;  %v24_v19 = vld [vmem:[#allocation2] sm:$0xff]  ;;  %v26_v20 = vld [vmem:[#allocation2 + $0x10] sm:$0xff]  ;;  %p253_p0 = scmp.ne.s32.totalorder %s175_s10, %s252_s2  ;;  %p258_p2 = scmp.lt.s32.totalorder %s252_s2, %s252_s2 }
   0xa   :  { %233 = vmatprep.subr.bf16.mxu0 %v232_v11  ;;  %242 = vmatprep.subr.bf16.mxu1 %v232_v11  ;;  %v27_v18 = vld [vmem:[#allocation2 + $0x18] sm:$0xff] }
   0xb   :  { %p259_p3 = por %p258_p2, %p257_p1 }
   0xd   :  { %235 = vmatpush3.bf16.msra.mxu0 %v232_v11  ;;  %246 = vmatpush3.bf16.msra.mxu1 %v232_v11  ;;  %p260_p4 = pnand %p259_p3, %p253_p0 }
   0xe   :  { %237 = vmatprep.subr.bf16.mxu0 %v236_v14  ;;  %243 = vmatprep.subr.bf16.mxu1 %v236_v14 }
  0x11   :  { %239 = vmatpush3.bf16.msra.mxu0 %v236_v14  ;;  %247 = vmatpush3.bf16.msra.mxu1 %v236_v14 }
  0x14   :  { %219 = vmatmul.mubr.msk.f32.vlgmr.msra.gmra.mrb[0].mxu0 %vm40_vm1, %v29_v15  ;;  %222 = vmatmul.mubr.msk.f32.vlgmr.msra.gmra.mrb[0].mxu1 %vm40_vm1, %v31_v16 }
  0xe7   :  { %v220_v21 = vpop.f32.mrb[0].mxu0  ;;  %v223_v22 = vpop.f32.mrb[0].mxu1 }
  0xe8   :  { %v139_v23 = vadd.f32 %v220_v21, %v25_v17  ;;  %v141_v24 = vadd.f32 %v223_v22, %v27_v18  ;;  %v119_v25 = vpop.f32.mrb[1].mxu0  ;;  %v129_v26 = vpop.f32.mrb[1].mxu1 }
  0xe9   :  { %v138_v27 = vadd.f32 %v119_v25, %v24_v19  ;;  %v140_v28 = vadd.f32 %v129_v26, %v26_v20 }
  0xea   :  { %144 = vst.msk [vmem:[#allocation2 + $0x8] sm:$0xff] %vm19_vm0, %v139_v23  ;;  %146 = vst.msk [vmem:[#allocation2 + $0x18] sm:$0xff] %vm19_vm0, %v141_v24 }
  0xeb   :  { %143 = vst.msk [vmem:[#allocation2] sm:$0xff] %vm19_vm0, %v138_v27  ;;  %145 = vst.msk [vmem:[#allocation2 + $0x10] sm:$0xff] %vm19_vm0, %v140_v28 }
  0xf1   :  { %v151_v30 = vld [vmem:[#allocation2 + $0x8] sm:$0xff]  ;;  %v153_v31 = vld [vmem:[#allocation2 + $0x18] sm:$0xff] }
  0xf2   :  { %v150_v32 = vld [vmem:[#allocation2] sm:$0xff]  ;;  %v152_v33 = vld [vmem:[#allocation2 + $0x10] sm:$0xff]  ;;  %v162_v34 = vadd.f32 %v189_v29, %v151_v30  ;;  %v164_v35 = vadd.f32 %v189_v29, %v153_v31 }
  0xf3   :  { %v161_v36 = vadd.f32 %v189_v29, %v150_v32  ;;  %v163_v37 = vadd.f32 %v189_v29, %v152_v33 }
  0xf4   :  { %166 = vst.msk [vmem:[#allocation3 + $0x8] sm:$0xff] %vm19_vm0, %v162_v34  ;;  %168 = vst.msk [vmem:[#allocation3 + $0x18] sm:$0xff] %vm19_vm0, %v164_v35 }
  0xf5   :  { %165 = vst.msk [vmem:[#allocation3] sm:$0xff] %vm19_vm0, %v161_v36  ;;  %167 = vst.msk [vmem:[#allocation3 + $0x10] sm:$0xff] %vm19_vm0, %v163_v37 }
  0xf6   :  { %263 = shalt.err (!%p260_p4)
}
  0xf7   :  { %s264_s13 = scalar_lea.hbm %s370_s3, 512 }
  0xf8   :  { %p265_p5 = scmp.ne.s32.totalorder %s370_s3, %s264_s13  ;;  %p268_p6 = scmp.lt.u32.totalorder %s264_s13, %s370_s3 }
  0xfa   :  { %p270_p7 = pnand %p268_p6, %p265_p5 }
  0xfc   :  { %273 = shalt.err (!%p270_p7)
}
  0xfd   :  { %s278_s18 = smov 128   ;;  %s279_s19 = smov 8  }
  0xfe   :  { %180 = dma.vmem_to_hbm [thread:$0]  %s175_s10, 512, %s370_s3, [#allocation4], %s278_s18, %s278_s18, %s279_s19  }
  0xff   :  { %274 = dma.done.wait [#allocation4], 512  }
 0x100   :  { %275 = vsyncadd [#allocation4], 4294966784 }
 0x101   :  { %184 = vsyncpa [#allocation4], 1 }

</bundles_post_ra>
